<compile_context>
chip_gen: v5e
topology: v5e:2x2
jax: 0.10.0
libtpu: 0.0.40
codegen_flags: <defaults>
</compile_context>

<pallas_src>
import jax
import jax.numpy as jnp
from jax.experimental import pallas as pl
from jax.experimental.pallas import tpu as pltpu


def _identity_kernel(x_ref, o_ref):
    # Straight VMEM tile copy; the surrounding pipeline handles HBM <-> VMEM.
    o_ref[...] = x_ref[...]


def _identity_pallas_2d(x2):
    M, N = x2.shape
    # Large row tile (multiple of 8 sublanes) when the array is big; otherwise
    # one full-array block (full-extent blocks are exempt from the (8,128) rule).
    tm = M if M <= 512 else 512
    grid = (pl.cdiv(M, tm),)
    return pl.pallas_call(
        _identity_kernel,
        out_shape=jax.ShapeDtypeStruct((M, N), x2.dtype),
        grid_spec=pltpu.PrefetchScalarGridSpec(
            num_scalar_prefetch=0,
            grid=grid,
            in_specs=[pl.BlockSpec((tm, N), lambda i: (i, 0))],
            out_specs=pl.BlockSpec((tm, N), lambda i: (i, 0)),
        ),
        compiler_params=pltpu.CompilerParams(
            dimension_semantics=("parallel",),
        ),
    )(x2)


def _my_rnn_forward(x):
    # Flatten to a lane-dense 2-D view (rows, last_dim) for the copy kernel,
    # then restore the original shape.  No parameters, no compute: identity.
    orig_shape = x.shape
    if x.ndim == 0:
        x2 = x.reshape(1, 1)
    elif x.ndim == 1:
        x2 = x.reshape(1, -1)
    else:
        x2 = x.reshape(-1, x.shape[-1])
    y2 = _identity_pallas_2d(x2)
    return y2.reshape(orig_shape)


my_rnn_forward = jax.jit(_my_rnn_forward)


if __name__ == "__main__":
    key = jax.random.PRNGKey(0)
    # RNN-style input: batch=2, seq=8, hidden=32.
    b, s, h = 2, 8, 32
    x = jax.random.normal(key, (b, s, h), dtype=jnp.float32)

    y = my_rnn_forward(x)
    y = jax.block_until_ready(y)

    assert y.shape == x.shape and y.dtype == x.dtype
    assert jnp.array_equal(y, x)
    print("KERNEL_OK")
</pallas_src>

<mosaic_0001>
module attributes {stable_mosaic.version = 11 : i64} {
  func.func @_identity_kernel(%arg0: i32, %arg1: memref<16x32xf32, #tpu.memory_space<vmem>>, %arg2: memref<16x32xf32, #tpu.memory_space<vmem>>) attributes {dimension_semantics = [#tpu.dimension_semantics<parallel>], iteration_bounds = array<i64: 1>, scalar_prefetch = 0 : i64, scratch_operands = 0 : i64, tpu.core_type = #tpu.core_type<tc>, window_params = [{transform_indices = @transform_0, window_bounds = array<i64: 16, 32>}, {transform_indices = @transform_1, window_bounds = array<i64: 16, 32>}]} {
    %c0 = arith.constant 0 : index
    %c0_0 = arith.constant 0 : index
    %0 = vector.load %arg1[%c0, %c0_0] : memref<16x32xf32, #tpu.memory_space<vmem>>, vector<16x32xf32>
    %c0_1 = arith.constant 0 : index
    %c0_2 = arith.constant 0 : index
    %1 = vector.load %arg2[%c0_1, %c0_2] : memref<16x32xf32, #tpu.memory_space<vmem>>, vector<16x32xf32>
    tpu.vector_store %arg2[%c0_1, %c0_2], %0 {strides = array<i32>} : memref<16x32xf32, #tpu.memory_space<vmem>>, vector<16x32xf32>,
    return
  }
  func.func @transform_0(%arg0: i32) -> (i32, i32) {
    %c0_i32 = arith.constant 0 : i32
    %c0_i32_0 = arith.constant 0 : i32
    return %arg0, %c0_i32 : i32, i32
  }
  func.func @transform_1(%arg0: i32) -> (i32, i32) {
    %c0_i32 = arith.constant 0 : i32
    %c0_i32_0 = arith.constant 0 : i32
    return %arg0, %c0_i32 : i32, i32
  }
}

</mosaic_0001>

<bundles_post_ra>
// kernel: _my_rnn_forward.1
= control target key start
LH: loop header
LB: loop body
LE: loop exit
PB: predicated region body
PF: predicated region fallthrough
CT: control target
= control target key end

     0   :  { %6 = vsyncpa [#allocation3], 0  ;;  %s125_s0 = inlined_call_operand.hbm [shape: f32[16,32], index: 0, kind: input, shape index: {}]   ;;  %s126_s1 = inlined_call_operand.hbm [shape: f32[16,32], index: 1, kind: output, shape index: {}]  }
   0x1   :  { %7 = vsyncpa [#allocation4], 0  ;;  %s12_s8 = sshll.u32 %s125_s0, 4  ;;  %s105_s9 = smov [#allocation2]   ;;  %s13_s8 = int_to_ptr.hbm [resolvable:$true] %s12_s8 }
   0x2   :  { %s14_s10 = sshll.u32 %s105_s9, 4  ;;  %s106_s11 = smov 128   ;;  %s15_s10 = int_to_ptr.vmem [resolvable:$true] %s14_s10 }
   0x3   :  { %s107_s12 = smov 8  }
   0x4   :  { %20 = dma.hbm_to_vmem [thread:$0]  %s13_s8, 256, %s15_s10, [#allocation3], %s106_s11, %s106_s11, %s107_s12  }
   0x5   :  { %101 = dma.done.wait [#allocation3], 256  }
   0x6   :  { %102 = vsyncadd [#allocation3], 4294967040  ;;  %s108_s13 = smov [#allocation5]   ;;  %s36_s17 = sshll.u32 %s126_s1, 4  ;;  %vm27_vm0 = vcmask 261120   ;;  %v25_v0 = vld [vmem:[#allocation2] sm:$0xff]  ;;  %s37_s17 = int_to_ptr.hbm [resolvable:$true] %s36_s17 }
   0x7   :  { %s34_s14 = sshll.u32 %s108_s13, 4  ;;  %v26_v1 = vld [vmem:[#allocation2 + $0x8] sm:$0xff]  ;;  %28 = vst.msk [vmem:[#allocation5] sm:$0xff] %vm27_vm0, %v25_v0  ;;  %s35_s14 = int_to_ptr.vmem [resolvable:$true] %s34_s14 }
   0x8   :  { %29 = vst.msk [vmem:[#allocation5 + $0x8] sm:$0xff] %vm27_vm0, %v26_v1 }
   0x9   :  { %42 = dma.vmem_to_hbm [thread:$0]  %s35_s14, 256, %s37_s17, [#allocation4], %s106_s11, %s106_s11, %s107_s12  }
   0xa   :  { %103 = dma.done.wait [#allocation4], 256  }
   0xb   :  { %104 = vsyncadd [#allocation4], 4294967040 }
   0xc   :  { %47 = vsyncpa [#allocation3], 1 }
   0xd   :  { %48 = vsyncpa [#allocation4], 1 }

</bundles_post_ra>
